<compile_context>
chip_gen: v7x
topology: tpu7x:2x2x1
jax: 0.10.0
libtpu: 0.0.40
codegen_flags: <defaults>
</compile_context>

<pallas_src>
import jax
import jax.numpy as jnp
from jax.experimental import pallas as pl
from jax.experimental.pallas import tpu as pltpu


def _round_up(x, m):
    return ((x + m - 1) // m) * m


def _llama_mlp_kernel(x_ref, wgT_ref, wuT_ref, wdT_ref, o_ref, acc_ref):
    # x_ref  : (tm, H)   row tile of activations (revisited across j)
    # wgT_ref: (H, ti)   gate_proj.weight.T slice
    # wuT_ref: (H, ti)   up_proj.weight.T   slice
    # wdT_ref: (ti, H)   down_proj.weight.T slice (rows of (I, H))
    # o_ref  : (tm, H)   output tile (resident across the intermediate axis)
    # acc_ref: (tm, H)   f32 accumulator scratch
    j = pl.program_id(1)

    @pl.when(j == 0)
    def _():
        acc_ref[...] = jnp.zeros_like(acc_ref)

    x = x_ref[...]

    # MXU-canonical matmuls with f32 accumulation.
    gate = jnp.dot(x, wgT_ref[...], preferred_element_type=jnp.float32)
    up = jnp.dot(x, wuT_ref[...], preferred_element_type=jnp.float32)

    # SiLU(gate) * up in float32 (exp on the EUP, mul/add on the VPU).
    h = gate * (1.0 / (1.0 + jnp.exp(-gate))) * up

    # Partial down projection for this intermediate slice.
    acc_ref[...] += jnp.dot(h.astype(x.dtype), wdT_ref[...],
                            preferred_element_type=jnp.float32)

    @pl.when(j == pl.num_programs(1) - 1)
    def _():
        o_ref[...] = acc_ref[...].astype(o_ref.dtype)


def llama_mlp(x, w_gate, w_up, w_down, *, tile_m=256, tile_i=512,
              vmem_limit_bytes=64 * 1024 * 1024):
    """Fused LlamaMLP forward.

    x:       (..., H)
    w_gate:  (I, H)   gate_proj.weight (torch layout: out_features x in_features)
    w_up:    (I, H)   up_proj.weight
    w_down:  (H, I)   down_proj.weight
    returns: (..., H)
    """
    orig_shape = x.shape
    H = orig_shape[-1]
    I = w_gate.shape[0]
    assert w_gate.shape == (I, H), w_gate.shape
    assert w_up.shape == (I, H), w_up.shape
    assert w_down.shape == (H, I), w_down.shape

    x2d = x.reshape(-1, H)
    M = x2d.shape[0]

    # Row tile: multiple of 8 (sublanes); intermediate tile: multiple of 128 (lanes).
    tm = min(tile_m, _round_up(M, 8))
    ti = min(tile_i, _round_up(I, 128))

    Mp = _round_up(M, tm)
    Ip = _round_up(I, ti)

    if Mp != M:
        x2d = jnp.pad(x2d, ((0, Mp - M), (0, 0)))

    # One-time weight transposes (outside the kernel) so all in-kernel dots are
    # standard (contraction = last dim of lhs, first dim of rhs).
    wgT = w_gate.T                       # (H, I)
    wuT = w_up.T                         # (H, I)
    wdT = w_down.T                       # (I, H)
    if Ip != I:
        wgT = jnp.pad(wgT, ((0, 0), (0, Ip - I)))
        wuT = jnp.pad(wuT, ((0, 0), (0, Ip - I)))
        wdT = jnp.pad(wdT, ((0, Ip - I), (0, 0)))

    grid = (Mp // tm, Ip // ti)

    out = pl.pallas_call(
        _llama_mlp_kernel,
        out_shape=jax.ShapeDtypeStruct((Mp, H), x.dtype),
        grid_spec=pltpu.PrefetchScalarGridSpec(
            num_scalar_prefetch=0,
            grid=grid,
            in_specs=[
                pl.BlockSpec((tm, H), lambda i, j: (i, 0)),   # x row tile
                pl.BlockSpec((H, ti), lambda i, j: (0, j)),   # gate_proj.T slice
                pl.BlockSpec((H, ti), lambda i, j: (0, j)),   # up_proj.T slice
                pl.BlockSpec((ti, H), lambda i, j: (j, 0)),   # down_proj.T slice
            ],
            out_specs=pl.BlockSpec((tm, H), lambda i, j: (i, 0)),
            scratch_shapes=[pltpu.VMEM((tm, H), jnp.float32)],
        ),
        compiler_params=pltpu.CompilerParams(
            dimension_semantics=("parallel", "arbitrary"),
            vmem_limit_bytes=vmem_limit_bytes,
        ),
    )(x2d, wgT, wuT, wdT)

    return out[:M].reshape(orig_shape)


def llama_mlp_ref(x, w_gate, w_up, w_down):
    g = x @ w_gate.T
    u = x @ w_up.T
    return (jax.nn.silu(g) * u) @ w_down.T


if __name__ == "__main__":
    batch, seq, hidden, intermediate = 2, 8, 128, 256

    key = jax.random.PRNGKey(0)
    kx, kg, ku, kd = jax.random.split(key, 4)

    x = jax.random.normal(kx, (batch, seq, hidden), dtype=jnp.float32)
    w_gate = 0.02 * jax.random.normal(kg, (intermediate, hidden), dtype=jnp.float32)
    w_up = 0.02 * jax.random.normal(ku, (intermediate, hidden), dtype=jnp.float32)
    w_down = 0.02 * jax.random.normal(kd, (hidden, intermediate), dtype=jnp.float32)

    out = llama_mlp(x, w_gate, w_up, w_down)
    out = jax.block_until_ready(out)

    ref = llama_mlp_ref(x, w_gate, w_up, w_down)
    assert out.shape == x.shape and out.dtype == x.dtype
    max_err = float(jnp.max(jnp.abs(out - ref)))
    assert jnp.allclose(out, ref, atol=1e-3, rtol=1e-3), max_err

    print("KERNEL_OK")
</pallas_src>

<mosaic_0001>
module attributes {stable_mosaic.version = 11 : i64} {
  func.func @_llama_mlp_kernel(%arg0: i32, %arg1: i32, %arg2: memref<16x128xf32, #tpu.memory_space<vmem>>, %arg3: memref<128x256xf32, #tpu.memory_space<vmem>>, %arg4: memref<128x256xf32, #tpu.memory_space<vmem>>, %arg5: memref<256x128xf32, #tpu.memory_space<vmem>>, %arg6: memref<16x128xf32, #tpu.memory_space<vmem>>, %arg7: memref<16x128xf32, #tpu.memory_space<vmem>>) attributes {dimension_semantics = [#tpu.dimension_semantics<parallel>, #tpu.dimension_semantics<arbitrary>], iteration_bounds = array<i64: 1, 1>, scalar_prefetch = 0 : i64, scratch_operands = 1 : i64, tpu.core_type = #tpu.core_type<tc>, window_params = [{transform_indices = @transform_0, window_bounds = array<i64: 16, 128>}, {transform_indices = @transform_1, window_bounds = array<i64: 128, 256>}, {transform_indices = @transform_2, window_bounds = array<i64: 128, 256>}, {transform_indices = @transform_3, window_bounds = array<i64: 256, 128>}, {transform_indices = @transform_4, window_bounds = array<i64: 16, 128>}]} {
    %c0_i32 = arith.constant 0 : i32
    %0 = arith.cmpi eq, %arg1, %c0_i32 : i32
    %1 = arith.extui %0 : i1 to i32
    %c0_i32_0 = arith.constant 0 : i32
    %2 = arith.cmpi ne, %1, %c0_i32_0 : i32
    scf.if %2 {
      %cst_19 = arith.constant 0.000000e+00 : f32
      %25 = vector.broadcast %cst_19 : f32 to vector<16x128xf32>
      %c0_20 = arith.constant 0 : index
      %c0_21 = arith.constant 0 : index
      %26 = vector.load %arg7[%c0_20, %c0_21] : memref<16x128xf32, #tpu.memory_space<vmem>>, vector<16x128xf32>
      tpu.vector_store %arg7[%c0_20, %c0_21], %25 {strides = array<i32>} : memref<16x128xf32, #tpu.memory_space<vmem>>, vector<16x128xf32>,
    } else {
    }
    %c0 = arith.constant 0 : index
    %c0_1 = arith.constant 0 : index
    %3 = vector.load %arg2[%c0, %c0_1] : memref<16x128xf32, #tpu.memory_space<vmem>>, vector<16x128xf32>
    %c0_2 = arith.constant 0 : index
    %c0_3 = arith.constant 0 : index
    %4 = vector.load %arg3[%c0_2, %c0_3] : memref<128x256xf32, #tpu.memory_space<vmem>>, vector<128x256xf32>
    %cst = arith.constant dense<0.000000e+00> : vector<16x256xf32>
    %5 = tpu.matmul %3, %4, %cst {dimension_numbers = #tpu.dot_dimension_numbers<[1], [0], [0], [1], [0, 0, 1, 1], [], []>} : vector<16x128xf32>, vector<128x256xf32>, vector<16x256xf32> -> vector<16x256xf32>
    %c0_4 = arith.constant 0 : index
    %c0_5 = arith.constant 0 : index
    %6 = vector.load %arg4[%c0_4, %c0_5] : memref<128x256xf32, #tpu.memory_space<vmem>>, vector<128x256xf32>
    %cst_6 = arith.constant dense<0.000000e+00> : vector<16x256xf32>
    %7 = tpu.matmul %3, %6, %cst_6 {dimension_numbers = #tpu.dot_dimension_numbers<[1], [0], [0], [1], [0, 0, 1, 1], [], []>} : vector<16x128xf32>, vector<128x256xf32>, vector<16x256xf32> -> vector<16x256xf32>
    %cst_7 = arith.constant 0.000000e+00 : f32
    %8 = vector.broadcast %cst_7 : f32 to vector<16x256xf32>
    %9 = arith.subf %8, %5 : vector<16x256xf32>
    %10 = math.exp %9 : vector<16x256xf32>
    %cst_8 = arith.constant 1.000000e+00 : f32
    %11 = vector.broadcast %cst_8 : f32 to vector<16x256xf32>
    %12 = arith.addf %11, %10 : vector<16x256xf32>
    %cst_9 = arith.constant 1.000000e+00 : f32
    %13 = vector.broadcast %cst_9 : f32 to vector<16x256xf32>
    %14 = arith.divf %13, %12 : vector<16x256xf32>
    %15 = arith.mulf %5, %14 : vector<16x256xf32>
    %16 = arith.mulf %15, %7 : vector<16x256xf32>
    %c0_10 = arith.constant 0 : index
    %c0_11 = arith.constant 0 : index
    %17 = vector.load %arg7[%c0_10, %c0_11] : memref<16x128xf32, #tpu.memory_space<vmem>>, vector<16x128xf32>
    %c0_12 = arith.constant 0 : index
    %c0_13 = arith.constant 0 : index
    %18 = vector.load %arg5[%c0_12, %c0_13] : memref<256x128xf32, #tpu.memory_space<vmem>>, vector<256x128xf32>
    %cst_14 = arith.constant dense<0.000000e+00> : vector<16x128xf32>
    %19 = tpu.matmul %16, %18, %cst_14 {dimension_numbers = #tpu.dot_dimension_numbers<[1], [0], [0], [1], [0, 0, 1, 1], [], []>} : vector<16x256xf32>, vector<256x128xf32>, vector<16x128xf32> -> vector<16x128xf32>
    %20 = arith.addf %17, %19 : vector<16x128xf32>
    %c0_15 = arith.constant 0 : index
    %c0_16 = arith.constant 0 : index
    %21 = vector.load %arg7[%c0_15, %c0_16] : memref<16x128xf32, #tpu.memory_space<vmem>>, vector<16x128xf32>
    tpu.vector_store %arg7[%c0_15, %c0_16], %20 {strides = array<i32>} : memref<16x128xf32, #tpu.memory_space<vmem>>, vector<16x128xf32>,
    %c0_i32_17 = arith.constant 0 : i32
    %22 = arith.cmpi eq, %arg1, %c0_i32_17 : i32
    %23 = arith.extui %22 : i1 to i32
    %c0_i32_18 = arith.constant 0 : i32
    %24 = arith.cmpi ne, %23, %c0_i32_18 : i32
    scf.if %24 {
      %c0_19 = arith.constant 0 : index
      %c0_20 = arith.constant 0 : index
      %25 = vector.load %arg7[%c0_19, %c0_20] : memref<16x128xf32, #tpu.memory_space<vmem>>, vector<16x128xf32>
      %c0_21 = arith.constant 0 : index
      %c0_22 = arith.constant 0 : index
      %26 = vector.load %arg6[%c0_21, %c0_22] : memref<16x128xf32, #tpu.memory_space<vmem>>, vector<16x128xf32>
      tpu.vector_store %arg6[%c0_21, %c0_22], %25 {strides = array<i32>} : memref<16x128xf32, #tpu.memory_space<vmem>>, vector<16x128xf32>,
    } else {
    }
    return
  }
  func.func @transform_0(%arg0: i32, %arg1: i32) -> (i32, i32) {
    %c0_i32 = arith.constant 0 : i32
    %c0_i32_0 = arith.constant 0 : i32
    return %arg0, %c0_i32 : i32, i32
  }
  func.func @transform_1(%arg0: i32, %arg1: i32) -> (i32, i32) {
    %c0_i32 = arith.constant 0 : i32
    %c0_i32_0 = arith.constant 0 : i32
    return %c0_i32, %arg1 : i32, i32
  }
  func.func @transform_2(%arg0: i32, %arg1: i32) -> (i32, i32) {
    %c0_i32 = arith.constant 0 : i32
    %c0_i32_0 = arith.constant 0 : i32
    return %c0_i32, %arg1 : i32, i32
  }
  func.func @transform_3(%arg0: i32, %arg1: i32) -> (i32, i32) {
    %c0_i32 = arith.constant 0 : i32
    %c0_i32_0 = arith.constant 0 : i32
    return %arg1, %c0_i32 : i32, i32
  }
  func.func @transform_4(%arg0: i32, %arg1: i32) -> (i32, i32) {
    %c0_i32 = arith.constant 0 : i32
    %c0_i32_0 = arith.constant 0 : i32
    return %arg0, %c0_i32 : i32, i32
  }
}

</mosaic_0001>

<bundles_post_ra>
// kernel: tpu_custom_call.1
= control target key start
LH: loop header
LB: loop body
LE: loop exit
PB: predicated region body
PF: predicated region fallthrough
CT: control target
= control target key end

     0   :  { %9 = vsyncpa [#allocation4], 0  ;;  %s885_s0 = inlined_call_operand.hbm [shape: f32[16,128], index: 0, kind: input, shape index: {}]   ;;  %s886_s1 = inlined_call_operand.hbm [shape: f32[128,256], index: 1, kind: input, shape index: {}]   ;;  %s887_s2 = inlined_call_operand.hbm [shape: f32[128,256], index: 2, kind: input, shape index: {}]   ;;  %s888_s3 = inlined_call_operand.hbm [shape: f32[256,128], index: 3, kind: input, shape index: {}]   ;;  %s889_s4 = inlined_call_operand.hbm [shape: f32[16,128], index: 4, kind: output, shape index: {}]  }
   0x1   :  { %10 = vsyncpa [#allocation7], 0 }
   0x2   :  { %11 = vsyncpa [#allocation10], 0 }
   0x3   :  { %12 = vsyncpa [#allocation5], 0  ;;  %s764_s15 = smov [#allocation6]   ;;  %s646_s19 = scalar_lea.hbm %s886_s1, 4096 }
   0x4   :  { %s30_s16 = sshll.u32 %s764_s15, 4  ;;  %p647_p0 = scmp.ne.s32.totalorder %s886_s1, %s646_s19  ;;  %s31_s16 = int_to_ptr.vmem [resolvable:$true] %s30_s16 }
   0x5   :  { %p650_p1 = scmp.lt.u32.totalorder %s646_s19, %s886_s1 }
   0x7   :  { %p652_p2 = pnand %p650_p1, %p647_p0 }
   0x9   :  { %655 = shalt.err (!%p652_p2)
}
   0xa   :  { %s656_s24 = scalar_lea.vmem %s31_s16, 4096  ;;  %p661_p4 = scmp.lt.s32.totalorder %s31_s16, %s31_s16 }
   0xb   :  { %p657_p3 = scmp.ne.s32.totalorder %s31_s16, %s656_s24  ;;  %p662_p5 = scmp.lt.s32.totalorder %s656_s24, %s656_s24 }
   0xd   :  { %p663_p6 = por %p662_p5, %p661_p4 }
   0xf   :  { %p664_p7 = pnand %p663_p6, %p657_p3 }
  0x11   :  { %667 = shalt.err (!%p664_p7)
}
  0x12   :  { %s765_s25 = smov 256   ;;  %s766_s26 = smov 16  }
  0x13   :  { %36 = dma.hbm_to_vmem [thread:$0]  %s886_s1, 4096, %s31_s16, [#allocation7], %s765_s25, %s765_s25, %s766_s26  }
  0x14   :  { %s767_s29 = smov [#allocation3]   ;;  %s668_s7 = scalar_lea.hbm %s885_s0, 256 }
  0x15   :  { %s18_s30 = sshll.u32 %s767_s29, 4  ;;  %p669_p8 = scmp.ne.s32.totalorder %s885_s0, %s668_s7  ;;  %s19_s30 = int_to_ptr.vmem [resolvable:$true] %s18_s30 }
  0x16   :  { %p672_p9 = scmp.lt.u32.totalorder %s668_s7, %s885_s0 }
  0x18   :  { %p674_p10 = pnand %p672_p9, %p669_p8 }
  0x1a   :  { %677 = shalt.err (!%p674_p10)
}
  0x1b   :  { %s678_s12 = scalar_lea.vmem %s19_s30, 256  ;;  %p683_p12 = scmp.lt.s32.totalorder %s19_s30, %s19_s30 }
  0x1c   :  { %p679_p11 = scmp.ne.s32.totalorder %s19_s30, %s678_s12  ;;  %p684_p13 = scmp.lt.s32.totalorder %s678_s12, %s678_s12 }
  0x1e   :  { %p685_p0 = por %p684_p13, %p683_p12 }
  0x20   :  { %p686_p1 = pnand %p685_p0, %p679_p11 }
  0x22   :  { %689 = shalt.err (!%p686_p1)
}
  0x23   :  { %s768_s1 = smov 128   ;;  %s769_s13 = smov 8  }
  0x24   :  { %24 = dma.hbm_to_vmem [thread:$0]  %s885_s0, 256, %s19_s30, [#allocation4], %s768_s1, %s768_s1, %s769_s13  }
  0x25   :  { %s770_s16 = smov [#allocation8]   ;;  %s771_s18 = smov [#allocation9]  }
  0x26   :  { %s42_s17 = sshll.u32 %s770_s16, 4  ;;  %s54_s19 = sshll.u32 %s771_s18, 4  ;;  %s43_s17 = int_to_ptr.vmem [resolvable:$true] %s42_s17  ;;  %s829_s19 = int_to_ptr.vmem [resolvable:$true] %s54_s19 }
  0x27   :  { %s690_s22 = scalar_lea.hbm %s887_s2, 4096 }
  0x28   :  { %p691_p2 = scmp.ne.s32.totalorder %s887_s2, %s690_s22  ;;  %p694_p3 = scmp.lt.u32.totalorder %s690_s22, %s887_s2 }
  0x2a   :  { %p696_p4 = pnand %p694_p3, %p691_p2 }
  0x2c   :  { %699 = shalt.err (!%p696_p4)
}
  0x2d   :  { %s700_s0 = scalar_lea.vmem %s43_s17, 4096  ;;  %p705_p6 = scmp.lt.s32.totalorder %s43_s17, %s43_s17 }
  0x2e   :  { %p701_p5 = scmp.ne.s32.totalorder %s43_s17, %s700_s0  ;;  %p706_p7 = scmp.lt.s32.totalorder %s700_s0, %s700_s0 }
  0x30   :  { %p707_p8 = por %p706_p7, %p705_p6 }
  0x32   :  { %p708_p9 = pnand %p707_p8, %p701_p5 }
  0x34   :  { %711 = shalt.err (!%p708_p9)
}
  0x35   :  { %48 = dma.hbm_to_vmem [thread:$0]  %s887_s2, 4096, %s43_s17, [#allocation7], %s765_s25, %s765_s25, %s766_s26  }
  0x36   :  { %s712_s7 = scalar_lea.hbm %s888_s3, 4096 }
  0x37   :  { %p713_p10 = scmp.ne.s32.totalorder %s888_s3, %s712_s7  ;;  %p716_p11 = scmp.lt.u32.totalorder %s712_s7, %s888_s3 }
  0x39   :  { %p718_p12 = pnand %p716_p11, %p713_p10 }
  0x3b   :  { %721 = shalt.err (!%p718_p12)
}
  0x3c   :  { %s722_s12 = scalar_lea.vmem %s829_s19, 4096  ;;  %p727_p0 = scmp.lt.s32.totalorder %s829_s19, %s829_s19 }
  0x3d   :  { %p723_p13 = scmp.ne.s32.totalorder %s829_s19, %s722_s12  ;;  %p728_p1 = scmp.lt.s32.totalorder %s722_s12, %s722_s12 }
  0x3f   :  { %p729_p2 = por %p728_p1, %p727_p0 }
  0x41   :  { %p730_p3 = pnand %p729_p2, %p723_p13 }
  0x43   :  { %733 = shalt.err (!%p730_p3)
}
  0x44   :  { %60 = dma.hbm_to_vmem [thread:$0]  %s888_s3, 4096, %s829_s19, [#allocation10], %s768_s1, %s768_s1, %s769_s13  }
  0x45   :  { %756 = dma.done.wait [#allocation4], 256  }
  0x46   :  { %757 = vsyncadd [#allocation4], 4294967040 }
  0x47   :  { %758 = dma.done.wait [#allocation7], 8192  }
  0x48   :  { %759 = vsyncadd [#allocation7], 4294959104 }
  0x49   :  { %760 = dma.done.wait [#allocation10], 4096  }
  0x4a   :  { %761 = vsyncadd [#allocation10], 4294963200  ;;  %v772_v0 = vmov 0.0   ;;  %v82_v1 = vld [vmem:[#allocation6 + $0x8] sm:$0xff]  ;;  %v84_v2 = vld [vmem:[#allocation6 + $0x18] sm:$0xff]  ;;  %s773_s3 = smov [#allocation11]  }
  0x4b   :  { %177 = vmatprep.mubr.f32.mxu0 %v772_v0  ;;  %286 = vmatprep.mubr.f32.mxu1 %v772_v0  ;;  %v81_v3 = vld [vmem:[#allocation6] sm:$0xff]  ;;  %v508_v4 = vpack.c.bf16 %v84_v2, %v82_v1  ;;  %v83_v5 = vld [vmem:[#allocation6 + $0x10] sm:$0xff]  ;;  %v86_v6 = vld [vmem:[#allocation6 + $0x28] sm:$0xff]  ;;  %s456_s26 = sshll.u32 %s773_s3, 4  ;;  %s457_s26 = int_to_ptr.vmem [resolvable:$true] %s456_s26 }
  0x4c   :  { %v88_v7 = vld [vmem:[#allocation6 + $0x38] sm:$0xff]  ;;  %v510_v8 = vpack.c.bf16 %v83_v5, %v81_v3  ;;  %v85_v10 = vld [vmem:[#allocation6 + $0x20] sm:$0xff]  ;;  %v87_v11 = vld [vmem:[#allocation6 + $0x30] sm:$0xff]  ;;  %s734_s14 = scalar_lea.vmem %s457_s26, 256  ;;  %p739_p5 = scmp.lt.s32.totalorder %s457_s26, %s457_s26 }
  0x4d   :  { %v512_v9 = vpack.c.bf16 %v88_v7, %v86_v6  ;;  %v90_v12 = vld [vmem:[#allocation6 + $0x48] sm:$0xff]  ;;  %509 = vmatprep.subr.bf16.mxu0 %v508_v4  ;;  %v92_v13 = vld [vmem:[#allocation6 + $0x58] sm:$0xff]  ;;  %v514_v14 = vpack.c.bf16 %v87_v11, %v85_v10  ;;  %v89_v16 = vld [vmem:[#allocation6 + $0x40] sm:$0xff]  ;;  %p735_p4 = scmp.ne.s32.totalorder %s457_s26, %s734_s14  ;;  %p740_p6 = scmp.lt.s32.totalorder %s734_s14, %s734_s14 }
  0x4e   :  { %511 = vmatpush1.bf16.msra.mxu0 %v510_v8  ;;  %v516_v15 = vpack.c.bf16 %v92_v13, %v90_v12  ;;  %v91_v17 = vld [vmem:[#allocation6 + $0x50] sm:$0xff]  ;;  %v94_v18 = vld [vmem:[#allocation6 + $0x68] sm:$0xff]  ;;  %v96_v19 = vld [vmem:[#allocation6 + $0x78] sm:$0xff] }
  0x4f   :  { %513 = vmatprep.subr.bf16.mxu0 %v512_v9  ;;  %v518_v20 = vpack.c.bf16 %v91_v17, %v89_v16  ;;  %v520_v21 = vpack.c.bf16 %v96_v19, %v94_v18  ;;  %v93_v22 = vld [vmem:[#allocation6 + $0x60] sm:$0xff]  ;;  %v95_v23 = vld [vmem:[#allocation6 + $0x70] sm:$0xff]  ;;  %v98_v24 = vld [vmem:[#allocation6 + $0x88] sm:$0xff]  ;;  %p741_p7 = por %p740_p6, %p739_p5 }
  0x50   :  { %v100_v25 = vld [vmem:[#allocation6 + $0x98] sm:$0xff]  ;;  %v191_v26 = vld [vmem:[#allocation8 + $0x8] sm:$0xff]  ;;  %v97_v27 = vld [vmem:[#allocation6 + $0x80] sm:$0xff]  ;;  %v522_v31 = vpack.c.bf16 %v95_v23, %v93_v22 }
  0x51   :  { %v193_v28 = vld [vmem:[#allocation8 + $0x18] sm:$0xff]  ;;  %v190_v29 = vld [vmem:[#allocation8] sm:$0xff]  ;;  %v192_v30 = vld [vmem:[#allocation8 + $0x10] sm:$0xff]  ;;  %v524_v37 = vpack.c.bf16 %v100_v25, %v98_v24  ;;  %p742_p8 = pnand %p741_p7, %p735_p4 }
  0x52   :  { %515 = vmatpush1.bf16.msra.mxu0 %v514_v14  ;;  %v99_v32 = vld [vmem:[#allocation6 + $0x90] sm:$0xff]  ;;  %v540_v33 = vpack.c.bf16 %v193_v28, %v191_v26  ;;  %v542_v34 = vpack.c.bf16 %v192_v30, %v190_v29  ;;  %v195_v35 = vld [vmem:[#allocation8 + $0x28] sm:$0xff]  ;;  %v197_v36 = vld [vmem:[#allocation8 + $0x38] sm:$0xff] }
  0x53   :  { %517 = vmatprep.subr.bf16.mxu0 %v516_v15  ;;  %v102_v38 = vld [vmem:[#allocation6 + $0xa8] sm:$0xff]  ;;  %v544_v39 = vpack.c.bf16 %v197_v36, %v195_v35  ;;  %v194_v40 = vld [vmem:[#allocation8 + $0x20] sm:$0xff]  ;;  %v196_v41 = vld [vmem:[#allocation8 + $0x30] sm:$0xff]  ;;  %v526_v46 = vpack.c.bf16 %v99_v32, %v97_v27 }
  0x54   :  { %v104_v42 = vld [vmem:[#allocation6 + $0xb8] sm:$0xff]  ;;  %541 = vmatprep.subr.bf16.mxu1 %v540_v33  ;;  %v199_v43 = vld [vmem:[#allocation8 + $0x48] sm:$0xff]  ;;  %v546_v45 = vpack.c.bf16 %v196_v41, %v194_v40  ;;  %v101_v47 = vld [vmem:[#allocation6 + $0xa0] sm:$0xff] }
  0x55   :  { %v201_v44 = vld [vmem:[#allocation8 + $0x58] sm:$0xff]  ;;  %543 = vmatpush1.bf16.msra.mxu1 %v542_v34  ;;  %v198_v49 = vld [vmem:[#allocation8 + $0x40] sm:$0xff]  ;;  %v200_v50 = vld [vmem:[#allocation8 + $0x50] sm:$0xff]  ;;  %v528_v51 = vpack.c.bf16 %v104_v42, %v102_v38 }
  0x56   :  { %519 = vmatpush1.bf16.msra.mxu0 %v518_v20  ;;  %545 = vmatprep.subr.bf16.mxu1 %v544_v39  ;;  %v548_v48 = vpack.c.bf16 %v201_v44, %v199_v43  ;;  %v103_v52 = vld [vmem:[#allocation6 + $0xb0] sm:$0xff]  ;;  %v203_v53 = vld [vmem:[#allocation8 + $0x68] sm:$0xff]  ;;  %v205_v54 = vld [vmem:[#allocation8 + $0x78] sm:$0xff]  ;;  %v550_v57 = vpack.c.bf16 %v200_v50, %v198_v49 }
  0x57   :  { %521 = vmatprep.subr.bf16.mxu0 %v520_v21  ;;  %v106_v55 = vld [vmem:[#allocation6 + $0xc8] sm:$0xff]  ;;  %v108_v56 = vld [vmem:[#allocation6 + $0xd8] sm:$0xff]  ;;  %v530_v58 = vpack.c.bf16 %v103_v52, %v101_v47  ;;  %v105_v59 = vld [vmem:[#allocation6 + $0xc0] sm:$0xff]  ;;  %v552_v60 = vpack.c.bf16 %v205_v54, %v203_v53 }
  0x58   :  { %v202_v61 = vld [vmem:[#allocation8 + $0x60] sm:$0xff]  ;;  %v204_v62 = vld [vmem:[#allocation8 + $0x70] sm:$0xff]  ;;  %v532_v63 = vpack.c.bf16 %v108_v56, %v106_v55  ;;  %v207_v2 = vld [vmem:[#allocation8 + $0x88] sm:$0xff] }
  0x59   :  { %547 = vmatpush1.bf16.msra.mxu1 %v546_v45  ;;  %v107_v1 = vld [vmem:[#allocation6 + $0xd0] sm:$0xff]  ;;  %v209_v3 = vld [vmem:[#allocation8 + $0x98] sm:$0xff]  ;;  %v110_v4 = vld [vmem:[#allocation6 + $0xe8] sm:$0xff]  ;;  %v554_v6 = vpack.c.bf16 %v204_v62, %v202_v61 }
  0x5a   :  { %523 = vmatpush1.bf16.msra.mxu0 %v522_v31  ;;  %549 = vmatprep.subr.bf16.mxu1 %v548_v48  ;;  %v112_v5 = vld [vmem:[#allocation6 + $0xf8] sm:$0xff]  ;;  %v534_v7 = vpack.c.bf16 %v107_v1, %v105_v59  ;;  %v109_v8 = vld [vmem:[#allocation6 + $0xe0] sm:$0xff]  ;;  %v556_v9 = vpack.c.bf16 %v209_v3, %v207_v2  ;;  %v208_v11 = vld [vmem:[#allocation8 + $0x90] sm:$0xff] }
  0x5b   :  { %525 = vmatprep.subr.bf16.mxu0 %v524_v37  ;;  %v206_v10 = vld [vmem:[#allocation8 + $0x80] sm:$0xff]  ;;  %v536_v12 = vpack.c.bf16 %v112_v5, %v110_v4  ;;  %v111_v13 = vld [vmem:[#allocation6 + $0xf0] sm:$0xff]  ;;  %v211_v14 = vld [vmem:[#allocation8 + $0xa8] sm:$0xff] }
  0x5c   :  { %v213_v15 = vld [vmem:[#allocation8 + $0xb8] sm:$0xff]  ;;  %v558_v16 = vpack.c.bf16 %v208_v11, %v206_v10  ;;  %v538_v17 = vpack.c.bf16 %v111_v13, %v109_v8  ;;  %v210_v19 = vld [vmem:[#allocation8 + $0xa0] sm:$0xff]  ;;  %v212_v20 = vld [vmem:[#allocation8 + $0xb0] sm:$0xff] }
  0x5d   :  { %551 = vmatpush1.bf16.msra.mxu1 %v550_v57  ;;  %v560_v18 = vpack.c.bf16 %v213_v15, %v211_v14  ;;  %v215_v21 = vld [vmem:[#allocation8 + $0xc8] sm:$0xff]  ;;  %v217_v22 = vld [vmem:[#allocation8 + $0xd8] sm:$0xff]  ;;  %v562_v23 = vpack.c.bf16 %v212_v20, %v210_v19  ;;  %v79_v24 = vld [vmem:[#allocation3] sm:$0xff] }
  0x5e   :  { %527 = vmatpush1.bf16.msra.mxu0 %v526_v46  ;;  %553 = vmatprep.subr.bf16.mxu1 %v552_v60  ;;  %v564_v25 = vpack.c.bf16 %v217_v22, %v215_v21  ;;  %v214_v26 = vld [vmem:[#allocation8 + $0xc0] sm:$0xff]  ;;  %v216_v27 = vld [vmem:[#allocation8 + $0xd0] sm:$0xff]  ;;  %v219_v28 = vld [vmem:[#allocation8 + $0xe8] sm:$0xff] }
  0x5f   :  { %529 = vmatprep.subr.bf16.mxu0 %v528_v51  ;;  %v221_v29 = vld [vmem:[#allocation8 + $0xf8] sm:$0xff]  ;;  %v566_v30 = vpack.c.bf16 %v216_v27, %v214_v26  ;;  %v218_v33 = vld [vmem:[#allocation8 + $0xe0] sm:$0xff]  ;;  %v220_v34 = vld [vmem:[#allocation8 + $0xf0] sm:$0xff] }
  0x60   :  { %v80_v31 = vld [vmem:[#allocation3 + $0x8] sm:$0xff]  ;;  %v568_v32 = vpack.c.bf16 %v221_v29, %v219_v28  ;;  %v570_v35 = vpack.c.bf16 %v220_v34, %v218_v33  ;;  %v349_v36 = vld [vmem:[#allocation9 + $0x80] sm:$0xff]  ;;  %v350_v37 = vld [vmem:[#allocation9 + $0x88] sm:$0xff] }
  0x61   :  { %555 = vmatpush1.bf16.msra.mxu1 %v554_v6  ;;  %v572_v38 = vpack.c.bf16 %v350_v37, %v349_v36  ;;  %v333_v39 = vld [vmem:[#allocation9] sm:$0xff]  ;;  %v334_v40 = vld [vmem:[#allocation9 + $0x8] sm:$0xff]  ;;  %v351_v42 = vld [vmem:[#allocation9 + $0x90] sm:$0xff] }
  0x62   :  { %531 = vmatpush1.bf16.msra.mxu0 %v530_v58  ;;  %557 = vmatprep.subr.bf16.mxu1 %v556_v9  ;;  %v574_v41 = vpack.c.bf16 %v334_v40, %v333_v39  ;;  %v352_v43 = vld [vmem:[#allocation9 + $0x98] sm:$0xff]  ;;  %v335_v45 = vld [vmem:[#allocation9 + $0x10] sm:$0xff]  ;;  %v354_v48 = vld [vmem:[#allocation9 + $0xa8] sm:$0xff] }
  0x63   :  { %533 = vmatprep.subr.bf16.mxu0 %v532_v63  ;;  %v576_v44 = vpack.c.bf16 %v352_v43, %v351_v42  ;;  %v336_v46 = vld [vmem:[#allocation9 + $0x18] sm:$0xff]  ;;  %v337_v50 = vld [vmem:[#allocation9 + $0x20] sm:$0xff]  ;;  %v338_v51 = vld [vmem:[#allocation9 + $0x28] sm:$0xff] }
  0x64   :  { %v578_v47 = vpack.c.bf16 %v336_v46, %v335_v45  ;;  %v582_v52 = vpack.c.bf16 %v338_v51, %v337_v50  ;;  %v355_v53 = vld [vmem:[#allocation9 + $0xb0] sm:$0xff]  ;;  %v356_v54 = vld [vmem:[#allocation9 + $0xb8] sm:$0xff]  ;;  %v357_v59 = vld [vmem:[#allocation9 + $0xc0] sm:$0xff] }
  0x65   :  { %559 = vmatpush1.bf16.msra.mxu1 %v558_v16  ;;  %v584_v55 = vpack.c.bf16 %v356_v54, %v355_v53  ;;  %v339_v56 = vld [vmem:[#allocation9 + $0x30] sm:$0xff]  ;;  %v340_v57 = vld [vmem:[#allocation9 + $0x38] sm:$0xff]  ;;  %v358_v60 = vld [vmem:[#allocation9 + $0xc8] sm:$0xff] }
  0x66   :  { %535 = vmatpush1.bf16.msra.mxu0 %v534_v7  ;;  %561 = vmatprep.subr.bf16.mxu1 %v560_v18  ;;  %v586_v58 = vpack.c.bf16 %v340_v57, %v339_v56  ;;  %v588_v61 = vpack.c.bf16 %v358_v60, %v357_v59  ;;  %v341_v62 = vld [vmem:[#allocation9 + $0x40] sm:$0xff]  ;;  %v342_v63 = vld [vmem:[#allocation9 + $0x48] sm:$0xff]  ;;  %v359_v2 = vld [vmem:[#allocation9 + $0xd0] sm:$0xff] }
  0x67   :  { %537 = vmatprep.subr.bf16.mxu0 %v536_v12  ;;  %v590_v1 = vpack.c.bf16 %v342_v63, %v341_v62  ;;  %v360_v3 = vld [vmem:[#allocation9 + $0xd8] sm:$0xff]  ;;  %v343_v5 = vld [vmem:[#allocation9 + $0x50] sm:$0xff]  ;;  %v361_v8 = vld [vmem:[#allocation9 + $0xe0] sm:$0xff] }
  0x68   :  { %v592_v4 = vpack.c.bf16 %v360_v3, %v359_v2  ;;  %v344_v6 = vld [vmem:[#allocation9 + $0x58] sm:$0xff]  ;;  %v362_v9 = vld [vmem:[#allocation9 + $0xe8] sm:$0xff]  ;;  %v345_v11 = vld [vmem:[#allocation9 + $0x60] sm:$0xff] }
  0x69   :  { %563 = vmatpush1.bf16.msra.mxu1 %v562_v23  ;;  %v594_v7 = vpack.c.bf16 %v344_v6, %v343_v5  ;;  %v596_v10 = vpack.c.bf16 %v362_v9, %v361_v8  ;;  %v346_v12 = vld [vmem:[#allocation9 + $0x68] sm:$0xff]  ;;  %v363_v14 = vld [vmem:[#allocation9 + $0xf0] sm:$0xff]  ;;  %v364_v15 = vld [vmem:[#allocation9 + $0xf8] sm:$0xff] }
  0x6a   :  { %539 = vmatpush1.bf16.msra.mxu0 %v538_v17  ;;  %565 = vmatprep.subr.bf16.mxu1 %v564_v25  ;;  %v598_v13 = vpack.c.bf16 %v346_v12, %v345_v11  ;;  %v600_v16 = vpack.c.bf16 %v364_v15, %v363_v14  ;;  %v347_v17 = vld [vmem:[#allocation9 + $0x70] sm:$0xff]  ;;  %v348_v18 = vld [vmem:[#allocation9 + $0x78] sm:$0xff] }
  0x6b   :  { %573 = vmatprep.subr.bf16.mxu0 %v572_v38  ;;  %v602_v19 = vpack.c.bf16 %v348_v18, %v347_v17 }
  0x6d   :  { %178 = vmatmul.mubr.f32.vlgmr.msra.gmra.mrb[0].mxu0 %v79_v24  ;;  %567 = vmatpush1.bf16.msra.mxu1 %v566_v30 }
  0x6e   :  { %183 = vmatprep.mubr.f32.mxu0 %v772_v0  ;;  %569 = vmatprep.subr.bf16.mxu1 %v568_v32 }
  0x6f   :  { %575 = vmatpush3.bf16.msra.mxu0 %v574_v41 }
  0x70   :  { %577 = vmatprep.subr.bf16.mxu0 %v576_v44 }
  0x71   :  { %184 = vmatmul.mubr.f32.gmra.mrb[2].mxu0 %v80_v31  ;;  %571 = vmatpush1.bf16.msra.mxu1 %v570_v35 }
  0x72   :  { %604 = vmatprep.subr.bf16.mxu1 %v572_v38 }
  0x73   :  { %579 = vmatpush3.bf16.msra.mxu0 %v578_v47 }
  0x74   :  { %287 = vmatmul.mubr.f32.vlgmr.msra.gmra.mrb[0].mxu1 %v79_v24 }
  0x75   :  { %292 = vmatprep.mubr.f32.mxu1 %v772_v0  ;;  %612 = vmatpush3.bf16.msra.mxu1 %v574_v41  ;;  %v353_v0 = vld [vmem:[#allocation9 + $0xa0] sm:$0xff] }
  0x76   :  { %605 = vmatprep.subr.bf16.mxu1 %v576_v44  ;;  %v580_v49 = vpack.c.bf16 %v354_v48, %v353_v0 }
  0x78   :  { %293 = vmatmul.mubr.f32.gmra.mrb[2].mxu1 %v80_v31  ;;  %581 = vmatprep.subr.bf16.mxu0 %v580_v49 }
  0x79   :  { %613 = vmatpush3.bf16.msra.mxu1 %v578_v47  ;;  %583 = vmatpush3.bf16.msra.mxu0 %v582_v52 }
  0x7a   :  { %606 = vmatprep.subr.bf16.mxu1 %v580_v49  ;;  %585 = vmatprep.subr.bf16.mxu0 %v584_v55 }
  0x7d   :  { %614 = vmatpush3.bf16.msra.mxu1 %v582_v52  ;;  %587 = vmatpush3.bf16.msra.mxu0 %v586_v58 }
  0x7e   :  { %607 = vmatprep.subr.bf16.mxu1 %v584_v55  ;;  %589 = vmatprep.subr.bf16.mxu0 %v588_v61 }
  0x81   :  { %615 = vmatpush3.bf16.msra.mxu1 %v586_v58  ;;  %591 = vmatpush3.bf16.msra.mxu0 %v590_v1 }
  0x82   :  { %608 = vmatprep.subr.bf16.mxu1 %v588_v61  ;;  %593 = vmatprep.subr.bf16.mxu0 %v592_v4 }
  0x85   :  { %616 = vmatpush3.bf16.msra.mxu1 %v590_v1  ;;  %595 = vmatpush3.bf16.msra.mxu0 %v594_v7 }
  0x86   :  { %609 = vmatprep.subr.bf16.mxu1 %v592_v4  ;;  %597 = vmatprep.subr.bf16.mxu0 %v596_v10 }
  0x89   :  { %617 = vmatpush3.bf16.msra.mxu1 %v594_v7  ;;  %599 = vmatpush3.bf16.msra.mxu0 %v598_v13 }
  0x8a   :  { %610 = vmatprep.subr.bf16.mxu1 %v596_v10  ;;  %601 = vmatprep.subr.bf16.mxu0 %v600_v16 }
  0x8d   :  { %618 = vmatpush3.bf16.msra.mxu1 %v598_v13  ;;  %603 = vmatpush3.bf16.msra.mxu0 %v602_v19 }
  0x8e   :  { %611 = vmatprep.subr.bf16.mxu1 %v600_v16 }
  0x91   :  { %619 = vmatpush3.bf16.msra.mxu1 %v602_v19 }
 0x140   :  { %v179_v20 = vpop.f32.mrb[0].mxu0 }
 0x141   :  { %v299_v21 = vsub.f32 0.0, %v179_v20  ;;  %v181_v22 = vpop.f32.mrb[1].mxu0 }
 0x142   :  { %v300_v23 = vsub.f32 0.0, %v181_v22 }
 0x143   :  { %v303_v24 = vmul.f32 1.442695, %v299_v21 }
 0x144   :  { %v305_v25 = vmul.f32 1.442695, %v300_v23  ;;  %v185_v26 = vpop.f32.mrb[2].mxu0 }
 0x145   :  { %630 = vpow2.f32 %v303_v24  ;;  %v301_v27 = vsub.f32 0.0, %v185_v26  ;;  %v187_v28 = vpop.f32.mrb[3].mxu0 }
 0x146   :  { %632 = vpow2.f32 %v305_v25  ;;  %v302_v29 = vsub.f32 0.0, %v187_v28 }
 0x147   :  { %v307_v30 = vmul.f32 1.442695, %v301_v27  ;;  %v288_v32 = vpop.f32.mrb[0].mxu1 }
 0x148   :  { %v309_v31 = vmul.f32 1.442695, %v302_v29  ;;  %v290_v33 = vpop.f32.mrb[1].mxu1 }
 0x149   :  { %634 = vpow2.f32 %v307_v30 }
 0x14a   :  { %636 = vpow2.f32 %v309_v31 }
 0x14b   :  { %v294_v35 = vpop.f32.mrb[2].mxu1 }
 0x14c   :  { %v296_v38 = vpop.f32.mrb[3].mxu1 }
 0x14f   :  { %v631_v34 = vpop.eup %630 }
 0x150   :  { %v633_v36 = vpop.eup %632  ;;  %v311_v37 = vadd.f32 1.0, %v631_v34 }
 0x151   :  { %v312_v39 = vadd.f32 1.0, %v633_v36 }
 0x152   :  { %638 = vrcp.f32 %v311_v37 }
 0x153   :  { %v635_v40 = vpop.eup %634  ;;  %640 = vrcp.f32 %v312_v39 }
 0x154   :  { %v637_v41 = vpop.eup %636  ;;  %v313_v42 = vadd.f32 1.0, %v635_v40 }
 0x155   :  { %v314_v43 = vadd.f32 1.0, %v637_v41 }
 0x156   :  { %642 = vrcp.f32 %v313_v42 }
 0x157   :  { %644 = vrcp.f32 %v314_v43 }
 0x15c   :  { %v639_v44 = vpop.eup %638 }
 0x15d   :  { %v641_v45 = vpop.eup %640  ;;  %v323_v46 = vmul.f32 %v639_v44, %v179_v20 }
 0x15e   :  { %v324_v47 = vmul.f32 %v641_v45, %v181_v22 }
 0x15f   :  { %v327_v0 = vmul.f32 %v323_v46, %v288_v32 }
 0x160   :  { %v643_v48 = vpop.eup %642  ;;  %v328_v49 = vmul.f32 %v324_v47, %v290_v33 }
 0x161   :  { %v645_v50 = vpop.eup %644  ;;  %v325_v51 = vmul.f32 %v643_v48, %v185_v26 }
 0x162   :  { %v326_v52 = vmul.f32 %v645_v50, %v187_v28  ;;  %429 = vmatprep.mubr.f32.mxu0 %v328_v49 }
 0x163   :  { %v329_v53 = vmul.f32 %v325_v51, %v294_v35  ;;  %430 = vmatmul.mubr.f32.vlgmr.msra.gmra.mrb[4].mxu0 %v327_v0 }
 0x164   :  { %v330_v54 = vmul.f32 %v326_v52, %v296_v38 }
 0x166   :  { %434 = vmatprep.mubr.f32.mxu1 %v330_v54 }
 0x167   :  { %435 = vmatmul.mubr.f32.vlgmr.msra.gmra.mrb[4].mxu1 %v329_v53 }
 0x236   :  { %v502_v55 = vpop.f32.mrb[4].mxu0 }
 0x237   :  { %v503_v56 = vpop.f32.mrb[5].mxu0 }
 0x238   :  { %v504_v57 = vadd.f32 %v503_v56, %v502_v55 }
 0x23a   :  { %449 = vst [vmem:[#allocation11] sm:$0xff] %v504_v57  ;;  %v505_v58 = vpop.f32.mrb[4].mxu1 }
 0x23b   :  { %v506_v59 = vpop.f32.mrb[5].mxu1 }
 0x23c   :  { %v507_v60 = vadd.f32 %v506_v59, %v505_v58 }
 0x23e   :  { %450 = vst [vmem:[#allocation11 + $0x8] sm:$0xff] %v507_v60 }
 0x23f   :  { %745 = shalt.err (!%p742_p8)
}
 0x240   :  { %s746_s17 = scalar_lea.hbm %s889_s4, 256 }
 0x241   :  { %p747_p9 = scmp.ne.s32.totalorder %s889_s4, %s746_s17  ;;  %p750_p10 = scmp.lt.u32.totalorder %s746_s17, %s889_s4 }
 0x243   :  { %p752_p11 = pnand %p750_p10, %p747_p9 }
 0x245   :  { %755 = shalt.err (!%p752_p11)
}
 0x246   :  { %462 = dma.vmem_to_hbm [thread:$0]  %s457_s26, 256, %s889_s4, [#allocation5], %s768_s1, %s768_s1, %s769_s13  }
 0x247   :  { %762 = dma.done.wait [#allocation5], 256  }
 0x248   :  { %763 = vsyncadd [#allocation5], 4294967040 }
 0x249   :  { %466 = vsyncpa [#allocation4], 1 }
 0x24a   :  { %467 = vsyncpa [#allocation7], 1 }
 0x24b   :  { %468 = vsyncpa [#allocation10], 1 }
 0x24c   :  { %469 = vsyncpa [#allocation5], 1 }

</bundles_post_ra>
